<compile_context>
chip_gen: v6e
topology: v6e:2x2x1
jax: 0.10.0
libtpu: 0.0.40
codegen_flags: <defaults>
</compile_context>

<pallas_src>
import math

import jax
import jax.numpy as jnp
from jax import lax
from jax.experimental import pallas as pl
from jax.experimental.pallas import tpu as pltpu

_LOG10_OVER_20 = math.log(10.0) / 20.0
_EPS = 1e-30
_MIN_BLOCK_BYTES = 2 * 1024 * 1024  # ~2 MiB per stream per block -> HBM roofline plateau


def _round_up(x, m):
    return ((x + m - 1) // m) * m


def _vmem_budgets():
    """(tile_budget_bytes, vmem_limit_bytes) sized per TPU generation."""
    phys = 64 * 1024 * 1024  # conservative (v7x-safe) fallback
    try:
        phys = int(pltpu.get_tpu_info().vmem_capacity_bytes)
    except Exception:  # pragma: no cover - keep the conservative fallback
        pass
    # Half of physical VMEM for the pipelined tiles, 3/4 as the scoped limit:
    # v5e/v6e (128 MiB) -> 64 / 96 MiB; v7x (64 MiB) -> 32 / 48 MiB.
    return phys // 2, (phys * 3) // 4


# --------------------------------------------------------------------------
# Kernels
# --------------------------------------------------------------------------
def _one_pass_kernel(audio_ref, noise_ref, inv_snr_ref, out_ref):
    """Full-row blocks: per-row gain and application in a single pass."""
    a = audio_ref[...].astype(jnp.float32)            # (TB, Tp)
    n = noise_ref[...].astype(jnp.float32)            # (TB, Tp)
    sum_a2 = jnp.sum(a * a, axis=-1, keepdims=True)   # (TB, 1)
    sum_n2 = jnp.sum(n * n, axis=-1, keepdims=True)   # (TB, 1)
    # gain = rms(a) / (10^(snr/20) * rms(n)); 1/T cancels, rsqrt goes to EUP.
    gain = jnp.sqrt(sum_a2) * lax.rsqrt(jnp.maximum(sum_n2, _EPS)) * inv_snr_ref[...]
    out_ref[...] = (a + gain * n).astype(out_ref.dtype)


def _sumsq_kernel(audio_ref, noise_ref, sa_ref, sn_ref):
    """Pass 1 of the T-tiled path: accumulate per-row sums of squares."""
    @pl.when(pl.program_id(1) == 0)
    def _():
        sa_ref[...] = jnp.zeros_like(sa_ref)
        sn_ref[...] = jnp.zeros_like(sn_ref)

    a = audio_ref[...].astype(jnp.float32)
    n = noise_ref[...].astype(jnp.float32)
    sa_ref[...] += jnp.sum(a * a, axis=-1, keepdims=True)
    sn_ref[...] += jnp.sum(n * n, axis=-1, keepdims=True)


def _apply_gain_kernel(audio_ref, noise_ref, gain_ref, out_ref):
    """Pass 2 of the T-tiled path: out = audio + gain * noise."""
    a = audio_ref[...].astype(jnp.float32)
    n = noise_ref[...].astype(jnp.float32)
    out_ref[...] = (a + gain_ref[...] * n).astype(out_ref.dtype)


# --------------------------------------------------------------------------
# Wrappers
# --------------------------------------------------------------------------
def _pick_row_tile(B, Tp, tile_budget, itemsize):
    bytes_per_row = 6 * Tp * itemsize  # 3 streams x 2 pipeline buffers
    tb_cap = max(8, (tile_budget // bytes_per_row) // 8 * 8)
    # at least ~2 MiB per stream per block keeps DMAs near the HBM roofline
    tb_floor = _round_up(max(1, pl.cdiv(_MIN_BLOCK_BYTES, Tp * itemsize)), 8)
    tb = min(tb_cap, tb_floor)
    # keep >= 2 grid steps for v7x megacore when that doesn't shrink blocks
    # below the roofline floor (neutral on single-TC v5e/v6e)
    if B > 8:
        tb_mega = _round_up(pl.cdiv(B, 2), 8)
        if tb_mega >= tb_floor:
            tb = min(tb, tb_mega)
    if tb >= B:
        return B  # single full-batch block (block dim == array dim is allowed)
    return tb


def _pad_cols(x, Tp):
    T = x.shape[1]
    if Tp == T:
        return x
    return jnp.pad(x, ((0, 0), (0, Tp - T)))


def _one_pass(audio, noise, inv_snr, tile_budget, vmem_limit, donate_audio):
    B, T = audio.shape
    itemsize = jnp.dtype(audio.dtype).itemsize
    Tp = _round_up(T, 128)  # lane-dense (unmasked) loads / stores
    audio_p = _pad_cols(audio, Tp)
    noise_p = _pad_cols(noise, Tp)

    tb = _pick_row_tile(B, Tp, tile_budget, itemsize)
    grid = (pl.cdiv(B, tb),)

    cost = pl.CostEstimate(
        flops=6 * B * Tp,
        transcendentals=0,
        bytes_accessed=3 * B * Tp * itemsize + 2 * B * 4,
    )
    aliases = {0: 0} if (donate_audio and Tp == T) else {}

    out = pl.pallas_call(
        _one_pass_kernel,
        out_shape=jax.ShapeDtypeStruct((B, Tp), audio.dtype),
        grid=grid,
        in_specs=[
            pl.BlockSpec((tb, Tp), lambda i: (i, 0)),
            pl.BlockSpec((tb, Tp), lambda i: (i, 0)),
            pl.BlockSpec((tb, 1), lambda i: (i, 0)),
        ],
        out_specs=pl.BlockSpec((tb, Tp), lambda i: (i, 0)),
        compiler_params=pltpu.CompilerParams(
            dimension_semantics=("parallel",),
            vmem_limit_bytes=vmem_limit,
        ),
        cost_estimate=cost,
        input_output_aliases=aliases,
    )(audio_p, noise_p, inv_snr)
    return out[:, :T] if Tp != T else out


def _two_pass(audio, noise, inv_snr, tile_budget, vmem_limit):
    """T-tiled path for rows too long to fit full-T blocks in VMEM."""
    B, T = audio.shape
    itemsize = jnp.dtype(audio.dtype).itemsize

    tb = 8 if B > 8 else B
    tc_cap = tile_budget // (6 * max(tb, 1) * itemsize)
    tc = max(128, (tc_cap // 128) * 128)
    tc = min(tc, _round_up(T, 128))
    Tp = _round_up(T, tc)  # pad so every column block is fully valid (zeros)

    audio_p = _pad_cols(audio, Tp)
    noise_p = _pad_cols(noise, Tp)
    grid = (pl.cdiv(B, tb), Tp // tc)

    # Pass 1: per-row sums of squares (reduction axis last, "arbitrary").
    sa, sn = pl.pallas_call(
        _sumsq_kernel,
        out_shape=(
            jax.ShapeDtypeStruct((B, 1), jnp.float32),
            jax.ShapeDtypeStruct((B, 1), jnp.float32),
        ),
        grid=grid,
        in_specs=[
            pl.BlockSpec((tb, tc), lambda i, j: (i, j)),
            pl.BlockSpec((tb, tc), lambda i, j: (i, j)),
        ],
        out_specs=(
            pl.BlockSpec((tb, 1), lambda i, j: (i, 0)),
            pl.BlockSpec((tb, 1), lambda i, j: (i, 0)),
        ),
        compiler_params=pltpu.CompilerParams(
            dimension_semantics=("parallel", "arbitrary"),
            vmem_limit_bytes=vmem_limit,
        ),
    )(audio_p, noise_p)

    # Tiny (B, 1) gain math stays in XLA.
    gain = jnp.sqrt(sa) * lax.rsqrt(jnp.maximum(sn, _EPS)) * inv_snr

    # Pass 2: apply the per-row gain over (row, column) tiles.
    out = pl.pallas_call(
        _apply_gain_kernel,
        out_shape=jax.ShapeDtypeStruct((B, Tp), audio.dtype),
        grid=grid,
        in_specs=[
            pl.BlockSpec((tb, tc), lambda i, j: (i, j)),
            pl.BlockSpec((tb, tc), lambda i, j: (i, j)),
            pl.BlockSpec((tb, 1), lambda i, j: (i, 0)),
        ],
        out_specs=pl.BlockSpec((tb, tc), lambda i, j: (i, j)),
        compiler_params=pltpu.CompilerParams(
            dimension_semantics=("parallel", "parallel"),
            vmem_limit_bytes=vmem_limit,
        ),
    )(audio_p, noise_p, gain)
    return out[:, :T] if Tp != T else out


def add_colored_noise(audio, noise, snr_db, *, max_tile_bytes=None,
                      vmem_limit_bytes=None, donate_audio=False):
    """audio: (B, T), noise: (B, T), snr_db: (B,) or (B, 1) -> (B, T)."""
    B, T = audio.shape
    assert noise.shape == (B, T)
    snr_db = jnp.reshape(snr_db, (B, 1)).astype(jnp.float32)

    tile_budget, vmem_limit = _vmem_budgets()
    if max_tile_bytes is not None:
        tile_budget = max_tile_bytes
    if vmem_limit_bytes is not None:
        vmem_limit = vmem_limit_bytes

    # 10 ** (-snr_db / 20): tiny (B, 1) op precomputed in XLA (no per-block exp).
    inv_snr = jnp.exp(-snr_db * _LOG10_OVER_20)

    itemsize = jnp.dtype(audio.dtype).itemsize
    # 3 bulk streams x 2 pipeline buffers at the minimum 8-row tile.
    one_pass_fits = 6 * 8 * _round_up(T, 128) * itemsize <= tile_budget

    if one_pass_fits:
        return _one_pass(audio, noise, inv_snr, tile_budget, vmem_limit, donate_audio)
    return _two_pass(audio, noise, inv_snr, tile_budget, vmem_limit)


# --------------------------------------------------------------------------
# Host-side glue: batched colored-noise generation (no per-example loop).
# --------------------------------------------------------------------------
def gen_colored_noise(key, f_decay, num_samples, sample_rate):
    """Batched JAX port of torch_audiomentations AddColoredNoise._gen_noise.

    f_decay: (B,).  Returns (B, num_samples) f32.
    TODO(synk): rfft/irfft have no Pallas TPU equivalent; spectral shaping stays in XLA.
    """
    B = f_decay.shape[0]
    white = jax.random.normal(key, (B, sample_rate), dtype=jnp.float32)
    spec = jnp.fft.rfft(white, axis=-1)
    freqs = jnp.linspace(1.0, (sample_rate / 2.0) ** 0.5, spec.shape[-1])
    spec = spec * (1.0 / (freqs[None, :] ** f_decay[:, None]))
    colored = jnp.fft.irfft(spec, n=sample_rate, axis=-1)
    reps = int(math.ceil(num_samples / sample_rate))
    colored = jnp.tile(colored, (1, reps))[:, :num_samples]
    return colored.astype(jnp.float32)


def _reference(audio, noise, snr_db):
    rms_a = jnp.sqrt(jnp.mean(audio * audio, axis=-1, keepdims=True))
    rms_n = jnp.sqrt(jnp.mean(noise * noise, axis=-1, keepdims=True))
    return audio + rms_a / (10.0 ** (snr_db / 20.0)) * noise / rms_n


if __name__ == "__main__":
    key = jax.random.PRNGKey(0)
    sample_rate = 1024
    min_snr_in_db, max_snr_in_db = 3.0, 30.0
    min_f_decay, max_f_decay = -2.0, 2.0

    def make_inputs(B, T, salt):
        ka, ks, kf, kn = jax.random.split(jax.random.fold_in(key, salt), 4)
        audio = 0.1 * jax.random.normal(ka, (B, T), dtype=jnp.float32)
        snr_db = jax.random.uniform(ks, (B, 1), jnp.float32,
                                    minval=min_snr_in_db, maxval=max_snr_in_db)
        f_decay = jax.random.uniform(kf, (B,), jnp.float32,
                                     minval=min_f_decay, maxval=max_f_decay)
        noise = gen_colored_noise(kn, f_decay, T, sample_rate)
        return audio, noise, snr_db

    # 1) Default (auto-tiled, one-pass full-row) path.
    audio, noise, snr_db = make_inputs(16, 2048, salt=1)
    out = jax.block_until_ready(add_colored_noise(audio, noise, snr_db))
    assert out.shape == audio.shape and out.dtype == audio.dtype
    ref = _reference(audio, noise, snr_db)
    assert jnp.allclose(out, ref, atol=1e-5, rtol=1e-5), "one-pass mismatch"

    # 2) Forced two-pass T-tiled path (the long-audio / v7x-VMEM path) at small shapes.
    out2 = jax.block_until_ready(
        add_colored_noise(audio, noise, snr_db, max_tile_bytes=6 * 8 * 512 * 4))
    assert jnp.allclose(out2, ref, atol=1e-5, rtol=1e-5), "two-pass mismatch"

    # 3) Non-multiple-of-8 batch and non-lane-aligned length (padding + partial blocks).
    audio3, noise3, snr3 = make_inputs(12, 2000, salt=2)
    out3 = jax.block_until_ready(add_colored_noise(audio3, noise3, snr3))
    ref3 = _reference(audio3, noise3, snr3)
    assert out3.shape == audio3.shape
    assert jnp.allclose(out3, ref3, atol=1e-5, rtol=1e-5), "padded-path mismatch"

    print("KERNEL_OK")
</pallas_src>

<mosaic_0001>
module attributes {stable_mosaic.version = 11 : i64} {
  func.func @_one_pass_kernel(%arg0: i32, %arg1: memref<16x2048xf32, #tpu.memory_space<vmem>>, %arg2: memref<16x2048xf32, #tpu.memory_space<vmem>>, %arg3: memref<16x1xf32, #tpu.memory_space<vmem>>, %arg4: memref<16x2048xf32, #tpu.memory_space<vmem>>) attributes {dimension_semantics = [#tpu.dimension_semantics<parallel>], iteration_bounds = array<i64: 1>, scalar_prefetch = 0 : i64, scratch_operands = 0 : i64, tpu.core_type = #tpu.core_type<tc>, window_params = [{transform_indices = @transform_0, window_bounds = array<i64: 16, 2048>}, {transform_indices = @transform_1, window_bounds = array<i64: 16, 2048>}, {transform_indices = @transform_2, window_bounds = array<i64: 16, 1>}, {transform_indices = @transform_3, window_bounds = array<i64: 16, 2048>}]} {
    %c0 = arith.constant 0 : index
    %c0_0 = arith.constant 0 : index
    %0 = vector.load %arg1[%c0, %c0_0] : memref<16x2048xf32, #tpu.memory_space<vmem>>, vector<16x2048xf32>
    %c0_1 = arith.constant 0 : index
    %c0_2 = arith.constant 0 : index
    %1 = vector.load %arg2[%c0_1, %c0_2] : memref<16x2048xf32, #tpu.memory_space<vmem>>, vector<16x2048xf32>
    %2 = arith.mulf %0, %0 : vector<16x2048xf32>
    %cst = arith.constant dense<0.000000e+00> : vector<16xf32>
    %3 = vector.multi_reduction <add>, %2, %cst [1] : vector<16x2048xf32> to vector<16xf32>
    %4 = vector.shape_cast %3 : vector<16xf32> to vector<16x1xf32>
    %5 = arith.mulf %1, %1 : vector<16x2048xf32>
    %cst_3 = arith.constant dense<0.000000e+00> : vector<16xf32>
    %6 = vector.multi_reduction <add>, %5, %cst_3 [1] : vector<16x2048xf32> to vector<16xf32>
    %7 = vector.shape_cast %6 : vector<16xf32> to vector<16x1xf32>
    %8 = math.sqrt %4 : vector<16x1xf32>
    %cst_4 = arith.constant 1.000000e-30 : f32
    %9 = vector.broadcast %cst_4 : f32 to vector<16x1xf32>
    %10 = arith.maximumf %7, %9 : vector<16x1xf32>
    %11 = math.rsqrt %10 : vector<16x1xf32>
    %12 = arith.mulf %8, %11 : vector<16x1xf32>
    %c0_5 = arith.constant 0 : index
    %c0_6 = arith.constant 0 : index
    %13 = vector.load %arg3[%c0_5, %c0_6] : memref<16x1xf32, #tpu.memory_space<vmem>>, vector<16x1xf32>
    %14 = arith.mulf %12, %13 : vector<16x1xf32>
    %15 = vector.broadcast %14 : vector<16x1xf32> to vector<16x2048xf32>
    %16 = arith.mulf %15, %1 : vector<16x2048xf32>
    %17 = arith.addf %0, %16 : vector<16x2048xf32>
    %c0_7 = arith.constant 0 : index
    %c0_8 = arith.constant 0 : index
    %18 = vector.load %arg4[%c0_7, %c0_8] : memref<16x2048xf32, #tpu.memory_space<vmem>>, vector<16x2048xf32>
    tpu.vector_store %arg4[%c0_7, %c0_8], %17 {strides = array<i32>} : memref<16x2048xf32, #tpu.memory_space<vmem>>, vector<16x2048xf32>,
    return
  }
  func.func @transform_0(%arg0: i32) -> (i32, i32) {
    %c0_i32 = arith.constant 0 : i32
    %c0_i32_0 = arith.constant 0 : i32
    return %arg0, %c0_i32 : i32, i32
  }
  func.func @transform_1(%arg0: i32) -> (i32, i32) {
    %c0_i32 = arith.constant 0 : i32
    %c0_i32_0 = arith.constant 0 : i32
    return %arg0, %c0_i32 : i32, i32
  }
  func.func @transform_2(%arg0: i32) -> (i32, i32) {
    %c0_i32 = arith.constant 0 : i32
    %c0_i32_0 = arith.constant 0 : i32
    return %arg0, %c0_i32 : i32, i32
  }
  func.func @transform_3(%arg0: i32) -> (i32, i32) {
    %c0_i32 = arith.constant 0 : i32
    %c0_i32_0 = arith.constant 0 : i32
    return %arg0, %c0_i32 : i32, i32
  }
}

</mosaic_0001>

<bundles_post_ra>
// kernel: tpu_custom_call.1
= control target key start
LH: loop header
LB: loop body
LE: loop exit
PB: predicated region body
PF: predicated region fallthrough
CT: control target
= control target key end

     0   :  { %8 = vsyncpa [#allocation3], 0  ;;  %s839_s0 = inlined_call_operand.hbm [shape: f32[16,2048], index: 0, kind: input, shape index: {}]   ;;  %s840_s1 = inlined_call_operand.hbm [shape: f32[16,2048], index: 1, kind: input, shape index: {}]   ;;  %s841_s2 = inlined_call_operand.vmem [shape: f32[16,1], index: 2, kind: input, shape index: {}]   ;;  %s842_s3 = inlined_call_operand.hbm [shape: f32[16,2048], index: 3, kind: output, shape index: {}]  }
   0x1   :  { %9 = vsyncpa [#allocation6], 0 }
   0x2   :  { %10 = vsyncpa [#allocation4], 0  ;;  %s469_s12 = smov [#allocation2]  }
   0x3   :  { %s16_s13 = sshll.u32 %s469_s12, 4  ;;  %s17_s13 = int_to_ptr.vmem [resolvable:$true] %s16_s13 }
   0x4   :  { %s411_s14 = scalar_lea.vmem %s17_s13, 4096  ;;  %p416_p1 = scmp.lt.s32.totalorder %s17_s13, %s17_s13 }
   0x5   :  { %p412_p0 = scmp.ne.s32.totalorder %s17_s13, %s411_s14  ;;  %p417_p2 = scmp.lt.s32.totalorder %s411_s14, %s411_s14 }
   0x7   :  { %p418_p3 = por %p417_p2, %p416_p1 }
   0x9   :  { %p419_p4 = pnand %p418_p3, %p412_p0 }
   0xb   :  { %422 = shalt.err (!%p419_p4)
}
   0xc   :  { %s470_s15 = smov 2048   ;;  %s471_s16 = smov 128  }
   0xd   :  { %22 = dma.hbm_to_vmem [thread:$0]  %s839_s0, 4096, %s17_s13, [#allocation3], %s470_s15, %s470_s15, %s471_s16  }
   0xe   :  { %s472_s19 = smov [#allocation5]  }
   0xf   :  { %s28_s20 = sshll.u32 %s472_s19, 4  ;;  %s29_s20 = int_to_ptr.vmem [resolvable:$true] %s28_s20 }
  0x10   :  { %s431_s21 = scalar_lea.vmem %s29_s20, 4096  ;;  %p436_p6 = scmp.lt.s32.totalorder %s29_s20, %s29_s20 }
  0x11   :  { %p432_p5 = scmp.ne.s32.totalorder %s29_s20, %s431_s21  ;;  %p437_p7 = scmp.lt.s32.totalorder %s431_s21, %s431_s21 }
  0x13   :  { %p438_p8 = por %p437_p7, %p436_p6 }
  0x15   :  { %p439_p9 = pnand %p438_p8, %p432_p5 }
  0x17   :  { %442 = shalt.err (!%p439_p9)
}
  0x18   :  { %34 = dma.hbm_to_vmem [thread:$0]  %s840_s1, 4096, %s29_s20, [#allocation6], %s470_s15, %s470_s15, %s471_s16  }
  0x19   :  { %463 = dma.done.wait [#allocation3], 4096  }
  0x1a   :  { %464 = vsyncadd [#allocation3], 4294963200 }
  0x1b   :  { %465 = dma.done.wait [#allocation6], 4096  }
  0x1c   :  { %466 = vsyncadd [#allocation6], 4294963200  ;;  %v507_v0 = vld [vmem:[#allocation2] sm:$0xff]  ;;  %v509_v1 = vld [vmem:[#allocation2 + $0x8] sm:$0xff] }
  0x1d   :  { %v511_v2 = vld [vmem:[#allocation2 + $0x10] sm:$0xff]  ;;  %v513_v3 = vld [vmem:[#allocation2 + $0x18] sm:$0xff]  ;;  %v107_v4 = vmul.f32 %v507_v0, %v507_v0  ;;  %v108_v5 = vmul.f32 %v509_v1, %v509_v1  ;;  %v521_v7 = vld [vmem:[#allocation2 + $0x20] sm:$0xff] }
  0x1e   :  { %v109_v6 = vmul.f32 %v511_v2, %v511_v2  ;;  %v110_v8 = vmul.f32 %v513_v3, %v513_v3  ;;  %v525_v10 = vld [vmem:[#allocation2 + $0x28] sm:$0xff]  ;;  %v111_v11 = vmul.f32 %v521_v7, %v521_v7  ;;  %v529_v13 = vld [vmem:[#allocation5] sm:$0xff]  ;;  %v533_v15 = vld [vmem:[#allocation2 + $0x30] sm:$0xff] }
  0x1f   :  { %v139_v9 = vadd.f32 %v108_v5, %v107_v4  ;;  %v531_v14 = vld [vmem:[#allocation5 + $0x8] sm:$0xff]  ;;  %v535_v16 = vld [vmem:[#allocation5 + $0x10] sm:$0xff]  ;;  %v537_v17 = vld [vmem:[#allocation5 + $0x18] sm:$0xff]  ;;  %v173_v18 = vmul.f32 %v529_v13, %v529_v13  ;;  %v112_v20 = vmul.f32 %v525_v10, %v525_v10  ;;  %v113_v27 = vmul.f32 %v533_v15, %v533_v15 }
  0x20   :  { %v174_v19 = vmul.f32 %v531_v14, %v531_v14  ;;  %v545_v22 = vld [vmem:[#allocation5 + $0x20] sm:$0xff]  ;;  %v175_v23 = vmul.f32 %v535_v16, %v535_v16  ;;  %v549_v24 = vld [vmem:[#allocation2 + $0x38] sm:$0xff]  ;;  %v176_v25 = vmul.f32 %v537_v17, %v537_v17  ;;  %v555_v29 = vld [vmem:[#allocation5 + $0x28] sm:$0xff] }
  0x21   :  { %v140_v12 = vadd.f32 %v139_v9, %v109_v6  ;;  %v557_v30 = vld [vmem:[#allocation2 + $0x40] sm:$0xff]  ;;  %v177_v31 = vmul.f32 %v545_v22, %v545_v22  ;;  %v114_v34 = vmul.f32 %v549_v24, %v549_v24  ;;  %v565_v36 = vld [vmem:[#allocation5 + $0x30] sm:$0xff]  ;;  %v567_v37 = vld [vmem:[#allocation2 + $0x88] sm:$0xff]  ;;  %v178_v39 = vmul.f32 %v555_v29, %v555_v29 }
  0x22   :  { %v205_v26 = vadd.f32 %v174_v19, %v173_v18  ;;  %v561_v33 = vld [vmem:[#allocation2 + $0x80] sm:$0xff]  ;;  %861 = vst [vmem:[#allocation12_spill] sm:$0xff] %v567_v37  ;;  %v569_v38 = vld [vmem:[#allocation2 + $0x48] sm:$0xff]  ;;  %v573_v41 = vld [vmem:[#allocation2 + $0x90] sm:$0xff]  ;;  %v115_v42 = vmul.f32 %v557_v30, %v557_v30  ;;  %v124_v46 = vmul.f32 %v567_v37, %v567_v37  ;;  %v179_v48 = vmul.f32 %v565_v36, %v565_v36 }
  0x23   :  { %v141_v21 = vadd.f32 %v140_v12, %v110_v8  ;;  %860 = vst [vmem:[#allocation11_spill] sm:$0xff] %v561_v33  ;;  %862 = vst [vmem:[#allocation13_spill] sm:$0xff] %v573_v41  ;;  %v577_v44 = vld [vmem:[#allocation5 + $0x38] sm:$0xff]  ;;  %v123_v45 = vmul.f32 %v561_v33, %v561_v33  ;;  %v583_v47 = vld [vmem:[#allocation2 + $0x50] sm:$0xff]  ;;  %v116_v52 = vmul.f32 %v569_v38, %v569_v38 }
  0x24   :  { %v206_v32 = vadd.f32 %v205_v26, %v175_v23  ;;  %v587_v50 = vld [vmem:[#allocation2 + $0x98] sm:$0xff]  ;;  %v593_v54 = vld [vmem:[#allocation5 + $0x40] sm:$0xff]  ;;  %v125_v56 = vmul.f32 %v573_v41, %v573_v41  ;;  %v180_v57 = vmul.f32 %v577_v44, %v577_v44  ;;  %v603_v60 = vld [vmem:[#allocation5 + $0x88] sm:$0xff]  ;;  %v117_v62 = vmul.f32 %v583_v47, %v583_v47 }
  0x25   :  { %v142_v28 = vadd.f32 %v141_v21, %v111_v11  ;;  %863 = vst [vmem:[#allocation14_spill] sm:$0xff] %v587_v50  ;;  %v589_v51 = vld [vmem:[#allocation2 + $0x58] sm:$0xff]  ;;  %v595_v55 = vld [vmem:[#allocation2 + $0xa0] sm:$0xff]  ;;  %v609_v4 = vld [vmem:[#allocation5 + $0x48] sm:$0xff]  ;;  %v126_v5 = vmul.f32 %v587_v50, %v587_v50  ;;  %v156_v6 = vadd.f32 %v124_v46, %v123_v45  ;;  %v181_v9 = vmul.f32 %v593_v54, %v593_v54 }
  0x26   :  { %v207_v40 = vadd.f32 %v206_v32, %v176_v25  ;;  %864 = vst [vmem:[#allocation15_spill] sm:$0xff] %v595_v55  ;;  %v601_v59 = vld [vmem:[#allocation5 + $0x80] sm:$0xff]  ;;  %v118_v8 = vmul.f32 %v589_v51, %v589_v51  ;;  %v617_v12 = vld [vmem:[#allocation2 + $0xa8] sm:$0xff]  ;;  %v127_v18 = vmul.f32 %v595_v55, %v595_v55  ;;  %v621_v19 = vld [vmem:[#allocation5 + $0x90] sm:$0xff]  ;;  %v182_v32 = vmul.f32 %v609_v4, %v609_v4 }
  0x27   :  { %v143_v35 = vadd.f32 %v142_v28, %v112_v20  ;;  %v605_v61 = vld [vmem:[#allocation2 + $0x60] sm:$0xff]  ;;  %865 = vst [vmem:[#allocation16_spill] sm:$0xff] %v617_v12  ;;  %v623_v20 = vld [vmem:[#allocation2 + $0x68] sm:$0xff]  ;;  %v625_v23 = vld [vmem:[#allocation5 + $0x50] sm:$0xff]  ;;  %v157_v26 = vadd.f32 %v156_v6, %v125_v56  ;;  %v190_v28 = vmul.f32 %v603_v60, %v603_v60  ;;  %v128_v45 = vmul.f32 %v617_v12, %v617_v12 }
  0x28   :  { %v208_v49 = vadd.f32 %v207_v40, %v177_v31  ;;  %v627_v25 = vld [vmem:[#allocation2 + $0xb0] sm:$0xff]  ;;  %v119_v31 = vmul.f32 %v605_v61, %v605_v61  ;;  %v673_v12 = vld [vmem:[#allocation5 + $0x68] sm:$0xff]  ;;  %v705_v33 = vld [vmem:[#allocation2 + $0xd8] sm:$0xff] }
  0x29   :  { %v144_v43 = vadd.f32 %v143_v35, %v113_v27  ;;  %866 = vst [vmem:[#allocation17_spill] sm:$0xff] %v627_v25  ;;  %v189_v27 = vmul.f32 %v601_v59, %v601_v59  ;;  %v637_v35 = vld [vmem:[#allocation5 + $0x98] sm:$0xff]  ;;  %v158_v46 = vadd.f32 %v157_v26, %v126_v5  ;;  %v129_v56 = vmul.f32 %v627_v25, %v627_v25  ;;  %v661_v5 = vld [vmem:[#allocation2 + $0xc0] sm:$0xff]  ;;  %v687_v50 = vld [vmem:[#allocation5 + $0x70] sm:$0xff] }
  0x2a   :  { %v209_v58 = vadd.f32 %v208_v49, %v178_v39  ;;  %v639_v39 = vld [vmem:[#allocation2 + $0x70] sm:$0xff]  ;;  %v120_v49 = vmul.f32 %v623_v20, %v623_v20  ;;  %868 = vst [vmem:[#allocation19_spill] sm:$0xff] %v661_v5  ;;  %v186_v41 = vmul.f32 %v673_v12, %v673_v12  ;;  %872 = vst [vmem:[#allocation23_spill] sm:$0xff] %v705_v33 }
  0x2b   :  { %v145_v53 = vadd.f32 %v144_v43, %v114_v34  ;;  %v643_v43 = vld [vmem:[#allocation2 + $0xb8] sm:$0xff]  ;;  %v159_v6 = vadd.f32 %v158_v46, %v127_v18  ;;  %v675_v18 = vld [vmem:[#allocation2 + $0xc8] sm:$0xff] }
  0x2c   :  { %v210_v11 = vadd.f32 %v209_v58, %v179_v48  ;;  %867 = vst [vmem:[#allocation18_spill] sm:$0xff] %v643_v43  ;;  %v191_v48 = vmul.f32 %v621_v19, %v621_v19  ;;  %v657_v58 = vld [vmem:[#allocation2 + $0x78] sm:$0xff]  ;;  %v130_v25 = vmul.f32 %v643_v43, %v643_v43  ;;  %869 = vst [vmem:[#allocation20_spill] sm:$0xff] %v675_v18 }
  0x2d   :  { %v146_v63 = vadd.f32 %v145_v53, %v115_v42  ;;  %v641_v42 = vld [vmem:[#allocation5 + $0x58] sm:$0xff]  ;;  %v160_v46 = vadd.f32 %v159_v6, %v128_v45  ;;  %v122_v55 = vmul.f32 %v657_v58, %v657_v58  ;;  %v131_v43 = vmul.f32 %v661_v5, %v661_v5  ;;  %v689_v45 = vld [vmem:[#allocation2 + $0xd0] sm:$0xff] }
  0x2e   :  { %v211_v34 = vadd.f32 %v210_v11, %v180_v57  ;;  %v655_v57 = vld [vmem:[#allocation5 + $0xa0] sm:$0xff]  ;;  %v192_v11 = vmul.f32 %v637_v35, %v637_v35  ;;  %v184_v26 = vmul.f32 %v641_v42, %v641_v42  ;;  %870 = vst [vmem:[#allocation21_spill] sm:$0xff] %v689_v45 }
  0x2f   :  { %v147_v21 = vadd.f32 %v146_v63, %v116_v52  ;;  %v183_v52 = vmul.f32 %v625_v23, %v625_v23  ;;  %v659_v63 = vld [vmem:[#allocation5 + $0x60] sm:$0xff]  ;;  %v161_v6 = vadd.f32 %v160_v46, %v129_v56 }
  0x30   :  { %v212_v53 = vadd.f32 %v211_v34, %v181_v9  ;;  %v121_v9 = vmul.f32 %v639_v39, %v639_v39 }
  0x31   :  { %v148_v40 = vadd.f32 %v147_v21, %v117_v62  ;;  %v222_v21 = vadd.f32 %v190_v28, %v189_v27  ;;  %v193_v27 = vmul.f32 %v655_v57, %v655_v57 }
  0x32   :  { %v213_v34 = vadd.f32 %v212_v53, %v182_v32  ;;  %v185_v32 = vmul.f32 %v659_v63, %v659_v63 }
  0x33   :  { %v149_v62 = vadd.f32 %v148_v40, %v118_v8  ;;  %v671_v8 = vld [vmem:[#allocation5 + $0xa8] sm:$0xff]  ;;  %v223_v28 = vadd.f32 %v222_v21, %v191_v48 }
  0x34   :  { %v214_v53 = vadd.f32 %v213_v34, %v183_v52  ;;  %v194_v48 = vmul.f32 %v671_v8, %v671_v8  ;;  %v132_v52 = vmul.f32 %v675_v18, %v675_v18  ;;  %v697_v34 = vld [vmem:[#allocation5 + $0xb8] sm:$0xff] }
  0x35   :  { %v150_v40 = vadd.f32 %v149_v62, %v119_v31  ;;  %v685_v31 = vld [vmem:[#allocation5 + $0xb0] sm:$0xff]  ;;  %v224_v21 = vadd.f32 %v223_v28, %v192_v11  ;;  %871 = vst [vmem:[#allocation22_spill] sm:$0xff] %v697_v34  ;;  %v187_v11 = vmul.f32 %v687_v50, %v687_v50 }
  0x36   :  { %v215_v37 = vadd.f32 %v214_v53, %v184_v26  ;;  %v195_v56 = vmul.f32 %v685_v31, %v685_v31  ;;  %v133_v26 = vmul.f32 %v689_v45, %v689_v45  ;;  %v709_v53 = vld [vmem:[#allocation5 + $0xc0] sm:$0xff] }
  0x37   :  { %v151_v62 = vadd.f32 %v150_v40, %v120_v49  ;;  %v699_v49 = vld [vmem:[#allocation5 + $0x78] sm:$0xff]  ;;  %v162_v40 = vadd.f32 %v161_v6, %v130_v25  ;;  %v225_v46 = vadd.f32 %v224_v21, %v193_v27  ;;  %v196_v25 = vmul.f32 %v697_v34, %v697_v34  ;;  %v715_v21 = vld [vmem:[#allocation2 + $0xe0] sm:$0xff] }
  0x38   :  { %v216_v28 = vadd.f32 %v215_v37, %v185_v32  ;;  %v188_v27 = vmul.f32 %v699_v49, %v699_v49  ;;  %873 = vst [vmem:[#allocation24_spill] sm:$0xff] %v715_v21  ;;  %v717_v37 = vld [vmem:[#allocation5 + $0xc8] sm:$0xff]  ;;  %v134_v32 = vmul.f32 %v705_v33, %v705_v33  ;;  %v731_v33 = vld [vmem:[#allocation2 + $0xf0] sm:$0xff] }
  0x39   :  { %v152_v5 = vadd.f32 %v151_v62, %v121_v9  ;;  %v163_v9 = vadd.f32 %v162_v40, %v131_v43  ;;  %v226_v62 = vadd.f32 %v225_v46, %v194_v48  ;;  %v723_v40 = vld [vmem:[#allocation2 + $0xe8] sm:$0xff]  ;;  %v725_v48 = vld [vmem:[#allocation5 + $0xd0] sm:$0xff]  ;;  %875 = vst [vmem:[#allocation26_spill] sm:$0xff] %v731_v33 }
  0x3a   :  { %v217_v6 = vadd.f32 %v216_v28, %v186_v41  ;;  %874 = vst [vmem:[#allocation25_spill] sm:$0xff] %v723_v40  ;;  %v135_v41 = vmul.f32 %v715_v21, %v715_v21 }
  0x3b   :  { %v153_v18 = vadd.f32 %v152_v5, %v122_v55  ;;  %v164_v45 = vadd.f32 %v163_v9, %v132_v52  ;;  %v197_v55 = vmul.f32 %v709_v53, %v709_v53  ;;  %v227_v43 = vadd.f32 %v226_v62, %v195_v56  ;;  %v733_v52 = vld [vmem:[#allocation5 + $0xd8] sm:$0xff] }
  0x3c   :  { %v218_v5 = vadd.f32 %v217_v6, %v187_v11  ;;  %v136_v56 = vmul.f32 %v723_v40, %v723_v40  ;;  %v199_v9 = vmul.f32 %v725_v48, %v725_v48  ;;  %v739_v6 = vld [vmem:[#allocation2 + $0xf8] sm:$0xff] }
  0x3d   :  { %154 = vadd.xlane.f32.xlu0 %v153_v18  ;;  %v165_v46 = vadd.f32 %v164_v45, %v133_v26  ;;  %v198_v18 = vmul.f32 %v717_v37, %v717_v37  ;;  %v228_v28 = vadd.f32 %v227_v43, %v196_v25  ;;  %876 = vst [vmem:[#allocation27_spill] sm:$0xff] %v739_v6  ;;  %v741_v45 = vld [vmem:[#allocation5 + $0xe0] sm:$0xff] }
  0x3e   :  { %v219_v34 = vadd.f32 %v218_v5, %v188_v27  ;;  %v137_v26 = vmul.f32 %v731_v33, %v731_v33  ;;  %v200_v27 = vmul.f32 %v733_v52, %v733_v52  ;;  %v747_v5 = vld [vmem:[#allocation5 + $0xe8] sm:$0xff]  ;;  %v757_v33 = vld [vmem:[#allocation5 + $0xf8] sm:$0xff] }
  0x3f   :  { %v166_v11 = vadd.f32 %v165_v46, %v134_v32  ;;  %v229_v62 = vadd.f32 %v228_v28, %v197_v55  ;;  %v138_v32 = vmul.f32 %v739_v6, %v739_v6  ;;  %v753_v28 = vld [vmem:[#allocation5 + $0xf0] sm:$0xff] }
  0x40   :  { %220 = vadd.xlane.f32.xlu1 %v219_v34  ;;  %v201_v34 = vmul.f32 %v741_v45, %v741_v45 }
  0x41   :  { %v167_v25 = vadd.f32 %v166_v11, %v135_v41  ;;  %v230_v43 = vadd.f32 %v229_v62, %v198_v18  ;;  %v202_v41 = vmul.f32 %v747_v5, %v747_v5  ;;  %v203_v62 = vmul.f32 %v753_v28, %v753_v28 }
  0x43   :  { %v168_v46 = vadd.f32 %v167_v25, %v136_v56  ;;  %v231_v55 = vadd.f32 %v230_v43, %v199_v9  ;;  %v204_v56 = vmul.f32 %v757_v33, %v757_v33 }
  0x45   :  { %v169_v40 = vadd.f32 %v168_v46, %v137_v26  ;;  %v232_v11 = vadd.f32 %v231_v55, %v200_v27  ;;  %v473_v26 = vmov 0  }
  0x46   :  { %393 = vset.pattern.permute.xlu0 %v473_v26  ;;  %394 = vset.pattern.permute.xlu1 %v473_v26 }
  0x47   :  { %v170_v18 = vadd.f32 %v169_v40, %v138_v32  ;;  %v233_v21 = vadd.f32 %v232_v11, %v201_v34 }
  0x49   :  { %171 = vadd.xlane.f32.xlu0 %v170_v18  ;;  %v234_v25 = vadd.f32 %v233_v21, %v202_v41 }
  0x4b   :  { %v235_v9 = vadd.f32 %v234_v25, %v203_v62 }
  0x4d   :  { %v236_v43 = vadd.f32 %v235_v9, %v204_v56  ;;  %v259_v56 = vld [vmem:[%s841_s2] sm:$0xff] }
  0x4f   :  { %237 = vadd.xlane.f32.xlu1 %v236_v43 }
  0xc6   :  { %v155_v46 = vpop.xlane.xlu0 %154 }
  0xc7   :  { %395 = vrsqrt.f32 %v155_v46  ;;  %vm241_vm0 = vcmp.eq.f32.partialorder %v155_v46, inf  ;;  %v244_v11 = vand.u32 2147483648, %v155_v46  ;;  %vm243_vm1 = vcmp.eq.f32.partialorder %v155_v46, 0.0 }
  0xc9   :  { %v221_v27 = vpop.xlane.xlu1 %220 }
  0xca   :  { %v253_v55 = vmax.f32 %v221_v27, 1e-30 }
  0xcc   :  { %397 = vrsqrt.f32 %v253_v55 }
  0xd2   :  { %v172_v32 = vpop.xlane.xlu0 %171 }
  0xd3   :  { %399 = vrsqrt.f32 %v172_v32  ;;  %vm248_vm2 = vcmp.eq.f32.partialorder %v172_v32, inf  ;;  %v251_v55 = vand.u32 2147483648, %v172_v32  ;;  %vm250_vm3 = vcmp.eq.f32.partialorder %v172_v32, 0.0 }
  0xd4   :  { %v396_v40 = vpop.eup %395 }
  0xd5   :  { %v240_v6 = vmul.f32 %v396_v40, %v155_v46  ;;  %v260_v40 = vld [vmem:[%s841_s2 + $0x8] sm:$0xff]  ;;  %s474_s2 = smov [#allocation7]  }
  0xd6   :  { %s374_s26 = sshll.u32 %s474_s2, 4  ;;  %s375_s26 = int_to_ptr.vmem [resolvable:$true] %s374_s26 }
  0xd7   :  { %v242_v34 = vsel %vm241_vm0, %v155_v46, %v240_v6  ;;  %s443_s27 = scalar_lea.vmem %s375_s26, 4096  ;;  %p448_p11 = scmp.lt.s32.totalorder %s375_s26, %s375_s26 }
  0xd8   :  { %v245_v21 = vsel %vm243_vm1, %v244_v11, %v242_v34  ;;  %v238_v41 = vpop.xlane.xlu1 %237  ;;  %p444_p10 = scmp.ne.s32.totalorder %s375_s26, %s443_s27  ;;  %p449_p12 = scmp.lt.s32.totalorder %s443_s27, %s443_s27 }
  0xd9   :  { %v398_v18 = vpop.eup %397  ;;  %v254_v62 = vmax.f32 %v238_v41, 1e-30 }
  0xda   :  { %v257_v25 = vmul.f32 %v398_v18, %v245_v21  ;;  %p450_p13 = por %p449_p12, %p448_p11 }
  0xdb   :  { %401 = vrsqrt.f32 %v254_v62 }
  0xdc   :  { %v261_v9 = vmul.f32 %v259_v56, %v257_v25  ;;  %p451_p0 = pnand %p450_p13, %p444_p10 }
  0xde   :  { %265 = vperm.xlu0 %393, %v261_v9  }
  0xe0   :  { %v400_v43 = vpop.eup %399 }
  0xe1   :  { %v247_v26 = vmul.f32 %v400_v43, %v172_v32 }
  0xe3   :  { %v249_v27 = vsel %vm248_vm2, %v172_v32, %v247_v26 }
  0xe4   :  { %v252_v6 = vsel %vm250_vm3, %v251_v55, %v249_v27 }
  0xe8   :  { %v402_v46 = vpop.eup %401 }
  0xe9   :  { %v258_v34 = vmul.f32 %v402_v46, %v252_v6  ;;  %v878_v46 = vld [vmem:[#allocation11_spill] sm:$0xff] }
  0xeb   :  { %v262_v11 = vmul.f32 %v260_v40, %v258_v34  ;;  %v879_v40 = vld [vmem:[#allocation12_spill] sm:$0xff] }
  0xed   :  { %270 = vperm.xlu1 %394, %v262_v11   ;;  %v880_v11 = vld [vmem:[#allocation13_spill] sm:$0xff] }
 0x159   :  { %v266_v41 = vpop.permute.xlu0 %265 }
 0x15a   :  { %v273_v21 = vmul.f32 %v266_v41, %v529_v13  ;;  %v274_v18 = vmul.f32 %v266_v41, %v531_v14  ;;  %v275_v62 = vmul.f32 %v266_v41, %v535_v16  ;;  %v276_v56 = vmul.f32 %v266_v41, %v537_v17 }
 0x15b   :  { %v277_v32 = vmul.f32 %v266_v41, %v545_v22  ;;  %v278_v25 = vmul.f32 %v266_v41, %v555_v29  ;;  %v279_v9 = vmul.f32 %v266_v41, %v565_v36  ;;  %v280_v43 = vmul.f32 %v266_v41, %v577_v44 }
 0x15c   :  { %v281_v26 = vmul.f32 %v266_v41, %v593_v54  ;;  %v282_v27 = vmul.f32 %v266_v41, %v609_v4  ;;  %v283_v13 = vmul.f32 %v266_v41, %v625_v23  ;;  %v284_v14 = vmul.f32 %v266_v41, %v641_v42 }
 0x15d   :  { %v285_v16 = vmul.f32 %v266_v41, %v659_v63  ;;  %v286_v17 = vmul.f32 %v266_v41, %v673_v12  ;;  %v287_v22 = vmul.f32 %v266_v41, %v687_v50  ;;  %v288_v29 = vmul.f32 %v266_v41, %v699_v49  ;;  %v881_v41 = vld [vmem:[#allocation14_spill] sm:$0xff] }
 0x15e   :  { %v305_v36 = vadd.f32 %v273_v21, %v507_v0  ;;  %v306_v44 = vadd.f32 %v274_v18, %v509_v1  ;;  %v307_v54 = vadd.f32 %v275_v62, %v511_v2  ;;  %v308_v4 = vadd.f32 %v276_v56, %v513_v3  ;;  %v883_v21 = vld [vmem:[#allocation16_spill] sm:$0xff]  ;;  %v884_v18 = vld [vmem:[#allocation17_spill] sm:$0xff]  ;;  %v885_v62 = vld [vmem:[#allocation18_spill] sm:$0xff] }
 0x15f   :  { %v309_v23 = vadd.f32 %v277_v32, %v521_v7  ;;  %v310_v42 = vadd.f32 %v278_v25, %v525_v10  ;;  %v311_v63 = vadd.f32 %v279_v9, %v533_v15  ;;  %v312_v12 = vadd.f32 %v280_v43, %v549_v24  ;;  %v886_v56 = vld [vmem:[#allocation19_spill] sm:$0xff]  ;;  %v887_v32 = vld [vmem:[#allocation20_spill] sm:$0xff]  ;;  %v888_v9 = vld [vmem:[#allocation21_spill] sm:$0xff] }
 0x160   :  { %v313_v50 = vadd.f32 %v281_v26, %v557_v30  ;;  %v314_v49 = vadd.f32 %v282_v27, %v569_v38  ;;  %v315_v0 = vadd.f32 %v283_v13, %v583_v47  ;;  %v316_v1 = vadd.f32 %v284_v14, %v589_v51  ;;  %337 = vst [vmem:[#allocation7] sm:$0xff] %v305_v36  ;;  %v889_v26 = vld [vmem:[#allocation23_spill] sm:$0xff]  ;;  %v890_v13 = vld [vmem:[#allocation24_spill] sm:$0xff] }
 0x161   :  { %338 = vst [vmem:[#allocation7 + $0x8] sm:$0xff] %v306_v44  ;;  %339 = vst [vmem:[#allocation7 + $0x10] sm:$0xff] %v307_v54  ;;  %v317_v2 = vadd.f32 %v285_v16, %v605_v61  ;;  %v318_v3 = vadd.f32 %v286_v17, %v623_v20  ;;  %v319_v7 = vadd.f32 %v287_v22, %v639_v39  ;;  %v877_v39 = vld [vmem:[#allocation22_spill] sm:$0xff]  ;;  %v891_v16 = vld [vmem:[#allocation25_spill] sm:$0xff] }
 0x162   :  { %340 = vst [vmem:[#allocation7 + $0x18] sm:$0xff] %v308_v4  ;;  %v320_v10 = vadd.f32 %v288_v29, %v657_v58  ;;  %341 = vst [vmem:[#allocation7 + $0x20] sm:$0xff] %v309_v23  ;;  %v892_v22 = vld [vmem:[#allocation26_spill] sm:$0xff]  ;;  %v893_v36 = vld [vmem:[#allocation27_spill] sm:$0xff] }
 0x163   :  { %342 = vst [vmem:[#allocation7 + $0x28] sm:$0xff] %v310_v42  ;;  %343 = vst [vmem:[#allocation7 + $0x30] sm:$0xff] %v311_v63 }
 0x164   :  { %344 = vst [vmem:[#allocation7 + $0x38] sm:$0xff] %v312_v12  ;;  %345 = vst [vmem:[#allocation7 + $0x40] sm:$0xff] %v313_v50 }
 0x165   :  { %346 = vst [vmem:[#allocation7 + $0x48] sm:$0xff] %v314_v49  ;;  %347 = vst [vmem:[#allocation7 + $0x50] sm:$0xff] %v315_v0 }
 0x166   :  { %348 = vst [vmem:[#allocation7 + $0x58] sm:$0xff] %v316_v1  ;;  %349 = vst [vmem:[#allocation7 + $0x60] sm:$0xff] %v317_v2 }
 0x167   :  { %350 = vst [vmem:[#allocation7 + $0x68] sm:$0xff] %v318_v3  ;;  %351 = vst [vmem:[#allocation7 + $0x70] sm:$0xff] %v319_v7 }
 0x168   :  { %352 = vst [vmem:[#allocation7 + $0x78] sm:$0xff] %v320_v10  ;;  %v271_v15 = vpop.permute.xlu1 %270 }
 0x169   :  { %v289_v24 = vmul.f32 %v271_v15, %v601_v59  ;;  %v290_v30 = vmul.f32 %v271_v15, %v603_v60  ;;  %v291_v38 = vmul.f32 %v271_v15, %v621_v19  ;;  %v292_v47 = vmul.f32 %v271_v15, %v637_v35 }
 0x16a   :  { %v293_v51 = vmul.f32 %v271_v15, %v655_v57  ;;  %v294_v61 = vmul.f32 %v271_v15, %v671_v8  ;;  %v295_v20 = vmul.f32 %v271_v15, %v685_v31  ;;  %v296_v58 = vmul.f32 %v271_v15, %v877_v39 }
 0x16b   :  { %v297_v55 = vmul.f32 %v271_v15, %v709_v53  ;;  %v298_v6 = vmul.f32 %v271_v15, %v717_v37  ;;  %v299_v59 = vmul.f32 %v271_v15, %v725_v48  ;;  %v300_v60 = vmul.f32 %v271_v15, %v733_v52  ;;  %v882_v48 = vld [vmem:[#allocation15_spill] sm:$0xff] }
 0x16c   :  { %v301_v19 = vmul.f32 %v271_v15, %v741_v45  ;;  %v302_v35 = vmul.f32 %v271_v15, %v747_v5  ;;  %v303_v57 = vmul.f32 %v271_v15, %v753_v28  ;;  %v304_v8 = vmul.f32 %v271_v15, %v757_v33 }
 0x16d   :  { %v321_v31 = vadd.f32 %v289_v24, %v878_v46  ;;  %v322_v34 = vadd.f32 %v290_v30, %v879_v40  ;;  %v323_v53 = vadd.f32 %v291_v38, %v880_v11  ;;  %v324_v37 = vadd.f32 %v292_v47, %v881_v41 }
 0x16e   :  { %v325_v52 = vadd.f32 %v293_v51, %v882_v48  ;;  %v326_v45 = vadd.f32 %v294_v61, %v883_v21  ;;  %v327_v5 = vadd.f32 %v295_v20, %v884_v18  ;;  %v328_v28 = vadd.f32 %v296_v58, %v885_v62 }
 0x16f   :  { %v329_v33 = vadd.f32 %v297_v55, %v886_v56  ;;  %v330_v25 = vadd.f32 %v298_v6, %v887_v32  ;;  %v331_v43 = vadd.f32 %v299_v59, %v888_v9  ;;  %v332_v27 = vadd.f32 %v300_v60, %v889_v26  ;;  %353 = vst [vmem:[#allocation7 + $0x80] sm:$0xff] %v321_v31 }
 0x170   :  { %354 = vst [vmem:[#allocation7 + $0x88] sm:$0xff] %v322_v34  ;;  %355 = vst [vmem:[#allocation7 + $0x90] sm:$0xff] %v323_v53  ;;  %v333_v14 = vadd.f32 %v301_v19, %v890_v13  ;;  %v334_v17 = vadd.f32 %v302_v35, %v891_v16  ;;  %v335_v29 = vadd.f32 %v303_v57, %v892_v22 }
 0x171   :  { %356 = vst [vmem:[#allocation7 + $0x98] sm:$0xff] %v324_v37  ;;  %v336_v44 = vadd.f32 %v304_v8, %v893_v36  ;;  %357 = vst [vmem:[#allocation7 + $0xa0] sm:$0xff] %v325_v52 }
 0x172   :  { %358 = vst [vmem:[#allocation7 + $0xa8] sm:$0xff] %v326_v45  ;;  %359 = vst [vmem:[#allocation7 + $0xb0] sm:$0xff] %v327_v5 }
 0x173   :  { %360 = vst [vmem:[#allocation7 + $0xb8] sm:$0xff] %v328_v28  ;;  %361 = vst [vmem:[#allocation7 + $0xc0] sm:$0xff] %v329_v33 }
 0x174   :  { %362 = vst [vmem:[#allocation7 + $0xc8] sm:$0xff] %v330_v25  ;;  %363 = vst [vmem:[#allocation7 + $0xd0] sm:$0xff] %v331_v43 }
 0x175   :  { %364 = vst [vmem:[#allocation7 + $0xd8] sm:$0xff] %v332_v27  ;;  %365 = vst [vmem:[#allocation7 + $0xe0] sm:$0xff] %v333_v14 }
 0x176   :  { %366 = vst [vmem:[#allocation7 + $0xe8] sm:$0xff] %v334_v17  ;;  %367 = vst [vmem:[#allocation7 + $0xf0] sm:$0xff] %v335_v29 }
 0x177   :  { %368 = vst [vmem:[#allocation7 + $0xf8] sm:$0xff] %v336_v44 }
 0x178   :  { %454 = shalt.err (!%p451_p0)
}
 0x179   :  { %380 = dma.vmem_to_hbm [thread:$0]  %s375_s26, 4096, %s842_s3, [#allocation4], %s470_s15, %s470_s15, %s471_s16  }
 0x17a   :  { %467 = dma.done.wait [#allocation4], 4096  }
 0x17b   :  { %468 = vsyncadd [#allocation4], 4294963200 }
 0x17c   :  { %384 = vsyncpa [#allocation3], 1 }
 0x17d   :  { %385 = vsyncpa [#allocation6], 1 }
 0x17e   :  { %386 = vsyncpa [#allocation4], 1 }

</bundles_post_ra>
